<compile_context>
chip_gen: v7x
topology: tpu7x:2x2x1
jax: 0.10.0
libtpu: 0.0.40
codegen_flags: <defaults>
</compile_context>

<pallas_src>
import jax
import jax.numpy as jnp
from jax.experimental import pallas as pl
from jax.experimental.pallas import tpu as pltpu

IN_FEATURES = 3
HIDDEN = 64
OUT_FEATURES = 28 * 28       # 784


def _round_up(x, m):
    return ((x + m - 1) // m) * m


def _choose_tile_b(B, tile_b):
    """Batch tile: multiple of 8 sublanes, capped at tile_b, and split into
    >= 2 grid steps for B > 256 so v7x's two TensorCores both get work."""
    tile_b = min(tile_b, max(_round_up(B, 8), 8))
    if B > 256:
        tile_b = min(tile_b, _round_up(-(-B // 2), 256))
    return tile_b


def decoder_kernel(x_ref, w1_ref, b1_ref, w2_ref, b2_ref, o_ref):
    """out = relu(x @ W1 + b1) @ W2 + b2 for one batch tile."""
    x = x_ref[...]                       # (TILE_B, 3)
    w1 = w1_ref[...]                     # (3, 64)

    # First layer: three broadcast multiply-adds on the VPU (K=3 -> no MXU).
    h = (x[:, 0:1] * w1[0:1, :]
         + x[:, 1:2] * w1[1:2, :]
         + x[:, 2:3] * w1[2:3, :]
         + b1_ref[...])                  # (TILE_B, 64)
    h = jnp.maximum(h, 0.0)              # ReLU

    # Second layer: MXU matmul, f32 accumulation, direct 784-wide store.
    o = jnp.dot(h, w2_ref[...], preferred_element_type=jnp.float32)
    o_ref[...] = (o + b2_ref[...]).astype(o_ref.dtype)   # (TILE_B, 784)


def decoder_forward(x, w1, b1, w2, b2, *, tile_b=2048):
    B = x.shape[0]

    tile_b = _choose_tile_b(B, tile_b)
    b_pad = _round_up(B, tile_b)
    x_p = jnp.pad(x, ((0, b_pad - B), (0, 0))) if b_pad != B else x

    grid = (b_pad // tile_b,)

    cost = pl.CostEstimate(
        flops=2 * b_pad * (IN_FEATURES * HIDDEN + HIDDEN * OUT_FEATURES),
        transcendentals=0,
        bytes_accessed=4 * (b_pad * IN_FEATURES            # x read
                            + b_pad * OUT_FEATURES          # out write
                            + IN_FEATURES * HIDDEN + HIDDEN  # W1, b1
                            + HIDDEN * OUT_FEATURES + OUT_FEATURES),  # W2, b2
    )

    out = pl.pallas_call(
        decoder_kernel,
        out_shape=jax.ShapeDtypeStruct((b_pad, OUT_FEATURES), jnp.float32),
        grid=grid,
        in_specs=[
            # Batch tile of activations: streamed / double-buffered per step.
            pl.BlockSpec((tile_b, IN_FEATURES), lambda i: (i, 0)),
            # Weights & biases: constant index_map -> VMEM-resident across steps.
            pl.BlockSpec((IN_FEATURES, HIDDEN), lambda i: (0, 0)),
            pl.BlockSpec((1, HIDDEN), lambda i: (0, 0)),
            pl.BlockSpec((HIDDEN, OUT_FEATURES), lambda i: (0, 0)),
            pl.BlockSpec((1, OUT_FEATURES), lambda i: (0, 0)),
        ],
        out_specs=pl.BlockSpec((tile_b, OUT_FEATURES), lambda i: (i, 0)),
        compiler_params=pltpu.CompilerParams(
            dimension_semantics=("parallel",),   # batch axis -> both TCs on v7x
            vmem_limit_bytes=32 << 20,           # covers tile_b=2048 on v5e too
        ),
        cost_estimate=cost,
    )(x_p, w1, b1, w2, b2)

    return out if b_pad == B else out[:B]


def init_params(key):
    """Deterministic init matching the PyTorch module's shapes.

    Mimics nn.Linear default (uniform in +/- 1/sqrt(fan_in)); weights stored
    as (in_features, out_features) so the kernel computes x @ W; biases are
    stored as (1, F) rows.
    """
    k1, k2, k3, k4 = jax.random.split(key, 4)
    in1, hid, out = IN_FEATURES, HIDDEN, OUT_FEATURES

    bound1 = 1.0 / jnp.sqrt(in1)
    w1 = jax.random.uniform(k1, (in1, hid), jnp.float32, -bound1, bound1)
    b1 = jax.random.uniform(k2, (1, hid), jnp.float32, -bound1, bound1)

    bound2 = 1.0 / jnp.sqrt(hid)
    w2 = jax.random.uniform(k3, (hid, out), jnp.float32, -bound2, bound2)
    b2 = jax.random.uniform(k4, (1, out), jnp.float32, -bound2, bound2)
    return w1, b1, w2, b2


if __name__ == "__main__":
    key = jax.random.PRNGKey(0)
    k_params, k_x = jax.random.split(key)
    w1, b1, w2, b2 = init_params(k_params)

    # Small-batch case (single tile, exercises sublane handling).
    B = 8
    x = jax.random.normal(k_x, (B, IN_FEATURES), jnp.float32)
    out = jax.block_until_ready(decoder_forward(x, w1, b1, w2, b2))
    ref = jnp.maximum(x @ w1 + b1, 0.0) @ w2 + b2
    assert out.shape == (B, OUT_FEATURES)
    assert jnp.allclose(out, ref, atol=1e-4, rtol=1e-4)

    # Tiled case: non-multiple batch, grid > 1, weights resident across steps.
    B2 = 300
    x2 = jax.random.normal(jax.random.PRNGKey(1), (B2, IN_FEATURES), jnp.float32)
    out2 = jax.block_until_ready(decoder_forward(x2, w1, b1, w2, b2, tile_b=128))
    ref2 = jnp.maximum(x2 @ w1 + b1, 0.0) @ w2 + b2
    assert out2.shape == (B2, OUT_FEATURES)
    assert jnp.allclose(out2, ref2, atol=1e-4, rtol=1e-4)

    print("KERNEL_OK")
</pallas_src>

<mosaic_0001>
module attributes {stable_mosaic.version = 11 : i64} {
  func.func @decoder_kernel(%arg0: i32, %arg1: memref<8x3xf32, #tpu.memory_space<vmem>>, %arg2: memref<3x64xf32, #tpu.memory_space<vmem>>, %arg3: memref<1x64xf32, #tpu.memory_space<vmem>>, %arg4: memref<64x784xf32, #tpu.memory_space<vmem>>, %arg5: memref<1x784xf32, #tpu.memory_space<vmem>>, %arg6: memref<8x784xf32, #tpu.memory_space<vmem>>) attributes {dimension_semantics = [#tpu.dimension_semantics<parallel>], iteration_bounds = array<i64: 1>, scalar_prefetch = 0 : i64, scratch_operands = 0 : i64, tpu.core_type = #tpu.core_type<tc>, window_params = [{transform_indices = @transform_0, window_bounds = array<i64: 8, 3>}, {pipeline_mode = #tpu.pipeline_mode<synchronous>, transform_indices = @transform_1, window_bounds = array<i64: 3, 64>}, {pipeline_mode = #tpu.pipeline_mode<synchronous>, transform_indices = @transform_2, window_bounds = array<i64: 1, 64>}, {pipeline_mode = #tpu.pipeline_mode<synchronous>, transform_indices = @transform_3, window_bounds = array<i64: 64, 784>}, {pipeline_mode = #tpu.pipeline_mode<synchronous>, transform_indices = @transform_4, window_bounds = array<i64: 1, 784>}, {transform_indices = @transform_5, window_bounds = array<i64: 8, 784>}]} {
    %c0 = arith.constant 0 : index
    %c0_0 = arith.constant 0 : index
    %0 = vector.load %arg1[%c0, %c0_0] : memref<8x3xf32, #tpu.memory_space<vmem>>, vector<8x3xf32>
    %c0_1 = arith.constant 0 : index
    %c0_2 = arith.constant 0 : index
    %1 = vector.load %arg2[%c0_1, %c0_2] : memref<3x64xf32, #tpu.memory_space<vmem>>, vector<3x64xf32>
    %2 = vector.extract_strided_slice %0 {offsets = [0, 0], sizes = [8, 1], strides = [1, 1]} : vector<8x3xf32> to vector<8x1xf32>
    %3 = vector.extract_strided_slice %1 {offsets = [0, 0], sizes = [1, 64], strides = [1, 1]} : vector<3x64xf32> to vector<1x64xf32>
    %4 = vector.broadcast %2 : vector<8x1xf32> to vector<8x64xf32>
    %5 = vector.broadcast %3 : vector<1x64xf32> to vector<8x64xf32>
    %6 = arith.mulf %4, %5 : vector<8x64xf32>
    %7 = vector.extract_strided_slice %0 {offsets = [0, 1], sizes = [8, 1], strides = [1, 1]} : vector<8x3xf32> to vector<8x1xf32>
    %8 = vector.extract_strided_slice %1 {offsets = [1, 0], sizes = [1, 64], strides = [1, 1]} : vector<3x64xf32> to vector<1x64xf32>
    %9 = vector.broadcast %7 : vector<8x1xf32> to vector<8x64xf32>
    %10 = vector.broadcast %8 : vector<1x64xf32> to vector<8x64xf32>
    %11 = arith.mulf %9, %10 : vector<8x64xf32>
    %12 = arith.addf %6, %11 : vector<8x64xf32>
    %13 = vector.extract_strided_slice %0 {offsets = [0, 2], sizes = [8, 1], strides = [1, 1]} : vector<8x3xf32> to vector<8x1xf32>
    %14 = vector.extract_strided_slice %1 {offsets = [2, 0], sizes = [1, 64], strides = [1, 1]} : vector<3x64xf32> to vector<1x64xf32>
    %15 = vector.broadcast %13 : vector<8x1xf32> to vector<8x64xf32>
    %16 = vector.broadcast %14 : vector<1x64xf32> to vector<8x64xf32>
    %17 = arith.mulf %15, %16 : vector<8x64xf32>
    %18 = arith.addf %12, %17 : vector<8x64xf32>
    %c0_3 = arith.constant 0 : index
    %c0_4 = arith.constant 0 : index
    %19 = vector.load %arg3[%c0_3, %c0_4] : memref<1x64xf32, #tpu.memory_space<vmem>>, vector<1x64xf32>
    %20 = vector.broadcast %19 : vector<1x64xf32> to vector<8x64xf32>
    %21 = arith.addf %18, %20 : vector<8x64xf32>
    %cst = arith.constant 0.000000e+00 : f32
    %22 = vector.broadcast %cst : f32 to vector<8x64xf32>
    %23 = arith.maximumf %21, %22 : vector<8x64xf32>
    %c0_5 = arith.constant 0 : index
    %c0_6 = arith.constant 0 : index
    %24 = vector.load %arg4[%c0_5, %c0_6] : memref<64x784xf32, #tpu.memory_space<vmem>>, vector<64x784xf32>
    %cst_7 = arith.constant dense<0.000000e+00> : vector<8x784xf32>
    %25 = tpu.matmul %23, %24, %cst_7 {dimension_numbers = #tpu.dot_dimension_numbers<[1], [0], [0], [1], [0, 0, 1, 1], [], []>} : vector<8x64xf32>, vector<64x784xf32>, vector<8x784xf32> -> vector<8x784xf32>
    %c0_8 = arith.constant 0 : index
    %c0_9 = arith.constant 0 : index
    %26 = vector.load %arg5[%c0_8, %c0_9] : memref<1x784xf32, #tpu.memory_space<vmem>>, vector<1x784xf32>
    %27 = vector.broadcast %26 : vector<1x784xf32> to vector<8x784xf32>
    %28 = arith.addf %25, %27 : vector<8x784xf32>
    %c0_10 = arith.constant 0 : index
    %c0_11 = arith.constant 0 : index
    %29 = vector.load %arg6[%c0_10, %c0_11] : memref<8x784xf32, #tpu.memory_space<vmem>>, vector<8x784xf32>
    tpu.vector_store %arg6[%c0_10, %c0_11], %28 {strides = array<i32>} : memref<8x784xf32, #tpu.memory_space<vmem>>, vector<8x784xf32>,
    return
  }
  func.func @transform_0(%arg0: i32) -> (i32, i32) {
    %c0_i32 = arith.constant 0 : i32
    %c0_i32_0 = arith.constant 0 : i32
    return %arg0, %c0_i32 : i32, i32
  }
  func.func @transform_1(%arg0: i32) -> (i32, i32) {
    %c0_i32 = arith.constant 0 : i32
    %c0_i32_0 = arith.constant 0 : i32
    %c0_i32_1 = arith.constant 0 : i32
    return %c0_i32, %c0_i32_0 : i32, i32
  }
  func.func @transform_2(%arg0: i32) -> (i32, i32) {
    %c0_i32 = arith.constant 0 : i32
    %c0_i32_0 = arith.constant 0 : i32
    %c0_i32_1 = arith.constant 0 : i32
    return %c0_i32, %c0_i32_0 : i32, i32
  }
  func.func @transform_3(%arg0: i32) -> (i32, i32) {
    %c0_i32 = arith.constant 0 : i32
    %c0_i32_0 = arith.constant 0 : i32
    %c0_i32_1 = arith.constant 0 : i32
    return %c0_i32, %c0_i32_0 : i32, i32
  }
  func.func @transform_4(%arg0: i32) -> (i32, i32) {
    %c0_i32 = arith.constant 0 : i32
    %c0_i32_0 = arith.constant 0 : i32
    %c0_i32_1 = arith.constant 0 : i32
    return %c0_i32, %c0_i32_0 : i32, i32
  }
  func.func @transform_5(%arg0: i32) -> (i32, i32) {
    %c0_i32 = arith.constant 0 : i32
    %c0_i32_0 = arith.constant 0 : i32
    return %arg0, %c0_i32 : i32, i32
  }
}

</mosaic_0001>

<bundles_post_ra>
// kernel: tpu_custom_call.1
= control target key start
LH: loop header
LB: loop body
LE: loop exit
PB: predicated region body
PF: predicated region fallthrough
CT: control target
= control target key end

     0   :  { %10 = vsyncpa [#allocation3], 0  ;;  %s741_s0 = inlined_call_operand.vmem [shape: f32[8,3], index: 0, kind: input, shape index: {}]   ;;  %s742_s1 = inlined_call_operand.vmem [shape: f32[3,64], index: 1, kind: input, shape index: {}]   ;;  %s743_s2 = inlined_call_operand.vmem [shape: f32[1,64], index: 2, kind: input, shape index: {}]   ;;  %s744_s3 = inlined_call_operand.hbm [shape: f32[64,784], index: 3, kind: input, shape index: {}]   ;;  %s745_s4 = inlined_call_operand.vmem [shape: f32[1,784], index: 4, kind: input, shape index: {}]   ;;  %s746_s5 = inlined_call_operand.hbm [shape: f32[8,784], index: 5, kind: output, shape index: {}]  }
   0x1   :  { %11 = vsyncpa [#allocation4], 0  ;;  %s634_s18 = smov [#allocation2]   ;;  %s586_s22 = scalar_lea.hbm %s744_s3, 7168 }
   0x2   :  { %s23_s19 = sshll.u32 %s634_s18, 4  ;;  %p587_p0 = scmp.ne.s32.totalorder %s744_s3, %s586_s22  ;;  %s24_s19 = int_to_ptr.vmem [resolvable:$true] %s23_s19 }
   0x3   :  { %p590_p1 = scmp.lt.u32.totalorder %s586_s22, %s744_s3 }
   0x5   :  { %p592_p2 = pnand %p590_p1, %p587_p0 }
   0x7   :  { %595 = shalt.err (!%p592_p2)
}
   0x8   :  { %s596_s27 = scalar_lea.vmem %s24_s19, 7168  ;;  %p601_p4 = scmp.lt.s32.totalorder %s24_s19, %s24_s19 }
   0x9   :  { %p597_p3 = scmp.ne.s32.totalorder %s24_s19, %s596_s27  ;;  %p602_p5 = scmp.lt.s32.totalorder %s596_s27, %s596_s27 }
   0xb   :  { %p603_p6 = por %p602_p5, %p601_p4 }
   0xd   :  { %p604_p7 = pnand %p603_p6, %p597_p3 }
   0xf   :  { %607 = shalt.err (!%p604_p7)
}
  0x10   :  { %s635_s28 = smov 896   ;;  %s636_s29 = smov 56  }
  0x11   :  { %29 = dma.hbm_to_vmem [thread:$0]  %s744_s3, 7168, %s24_s19, [#allocation3], %s635_s28, %s635_s28, %s636_s29  }
  0x12   :  { %630 = dma.done.wait [#allocation3], 7168  }
  0x13   :  { %631 = vsyncadd [#allocation3], 4294960128  ;;  %v637_v0 = vmov 0   ;;  %v638_v1 = vmov 2   ;;  %v35_v2 = vld [vmem:[%s741_s0] sm:$0xff]  ;;  %v77_v3 = vld [vmem:[#allocation2 + $0x8] sm:$0xff]  ;;  %v42_v57 = vlaneseq }
  0x14   :  { %582 = vset.pattern.permute.xlu0 %v637_v0  ;;  %584 = vset.pattern.permute.xlu1 %v638_v1  ;;  %v84_v4 = vld [vmem:[#allocation2 + $0x40] sm:$0xff]  ;;  %v79_v6 = vld [vmem:[#allocation2 + $0x18] sm:$0xff]  ;;  %v86_v7 = vld [vmem:[#allocation2 + $0x50] sm:$0xff]  ;;  %v639_v21 = vmov 1   ;;  %v640_v55 = vmov 0.0   ;;  %v641_v56 = vmov 0.0|0.0  }
  0x15   :  { %39 = vperm.xlu0 %582, %v35_v2   ;;  %58 = vperm.xlu1 %584, %v35_v2   ;;  %v512_v5 = vpack.c.bf16 %v84_v4, %v77_v3  ;;  %v76_v8 = vld [vmem:[#allocation2] sm:$0xff]  ;;  %v528_v9 = vpack.c.bf16 %v86_v7, %v79_v6  ;;  %v83_v10 = vld [vmem:[#allocation2 + $0x38] sm:$0xff]  ;;  %v78_v11 = vld [vmem:[#allocation2 + $0x10] sm:$0xff]  ;;  %v692_v58 = vshrl.u32 %v42_v57, 7  ;;  %vm169_vm0 = vcmask 523264  }
  0x16   :  { %v85_v12 = vld [vmem:[#allocation2 + $0x48] sm:$0xff]  ;;  %v514_v13 = vpack.c.bf16 %v83_v10, %v76_v8  ;;  %v91_v15 = vld [vmem:[#allocation2 + $0x78] sm:$0xff]  ;;  %v98_v16 = vld [vmem:[#allocation2 + $0xb0] sm:$0xff]  ;;  %237 = vmatprep.mubr.f32.mxu0 %v640_v55  ;;  %308 = vmatprep.mubr.f32.mxu1 %v640_v55  ;;  %vm642_vm1 = vmmov 0   ;;  %vm462_vm2 = vcmask 130048  }
  0x17   :  { %513 = vmatprep.subr.bf16.mxu0 %v512_v5  ;;  %v530_v14 = vpack.c.bf16 %v85_v12, %v78_v11  ;;  %529 = vmatprep.subr.bf16.mxu1 %v528_v9  ;;  %v516_v17 = vpack.c.bf16 %v98_v16, %v91_v15  ;;  %v93_v18 = vld [vmem:[#allocation2 + $0x88] sm:$0xff]  ;;  %v100_v19 = vld [vmem:[#allocation2 + $0xc0] sm:$0xff]  ;;  %v90_v20 = vld [vmem:[#allocation2 + $0x70] sm:$0xff]  ;;  %v44_v59 = vsub.s32 0, %v692_v58  ;;  %v53_v60 = vsub.s32 1, %v692_v58 }
  0x18   :  { %515 = vmatpush1.bf16.msra.mxu0 %v514_v13  ;;  %v532_v22 = vpack.c.bf16 %v100_v19, %v93_v18  ;;  %v97_v23 = vld [vmem:[#allocation2 + $0xa8] sm:$0xff]  ;;  %v92_v24 = vld [vmem:[#allocation2 + $0x80] sm:$0xff]  ;;  %v99_v25 = vld [vmem:[#allocation2 + $0xb8] sm:$0xff]  ;;  %v63_v61 = vsub.s32 2, %v692_v58 }
  0x19   :  { %583 = vset.pattern.permute.xlu0 %v639_v21  ;;  %531 = vmatpush1.bf16.msra.mxu1 %v530_v14  ;;  %v518_v26 = vpack.c.bf16 %v97_v23, %v90_v20  ;;  %v534_v27 = vpack.c.bf16 %v99_v25, %v92_v24  ;;  %v105_v28 = vld [vmem:[#allocation2 + $0xe8] sm:$0xff]  ;;  %v112_v29 = vld [vmem:[#allocation2 + $0x120] sm:$0xff]  ;;  %v107_v30 = vld [vmem:[#allocation2 + $0xf8] sm:$0xff] }
  0x1a   :  { %48 = vperm.xlu0 %583, %v35_v2   ;;  %517 = vmatprep.subr.bf16.mxu0 %v516_v17  ;;  %v520_v31 = vpack.c.bf16 %v112_v29, %v105_v28  ;;  %v114_v32 = vld [vmem:[#allocation2 + $0x130] sm:$0xff]  ;;  %v104_v33 = vld [vmem:[#allocation2 + $0xe0] sm:$0xff]  ;;  %v111_v34 = vld [vmem:[#allocation2 + $0x118] sm:$0xff] }
  0x1b   :  { %533 = vmatprep.subr.bf16.mxu1 %v532_v22  ;;  %v536_v35 = vpack.c.bf16 %v114_v32, %v107_v30  ;;  %v106_v36 = vld [vmem:[#allocation2 + $0xf0] sm:$0xff]  ;;  %v113_v37 = vld [vmem:[#allocation2 + $0x128] sm:$0xff]  ;;  %v522_v38 = vpack.c.bf16 %v111_v34, %v104_v33  ;;  %v119_v39 = vld [vmem:[#allocation2 + $0x158] sm:$0xff] }
  0x1c   :  { %519 = vmatpush1.bf16.msra.mxu0 %v518_v26  ;;  %v126_v40 = vld [vmem:[#allocation2 + $0x190] sm:$0xff]  ;;  %v121_v41 = vld [vmem:[#allocation2 + $0x168] sm:$0xff]  ;;  %v538_v42 = vpack.c.bf16 %v113_v37, %v106_v36  ;;  %v128_v44 = vld [vmem:[#allocation2 + $0x1a0] sm:$0xff] }
  0x1d   :  { %535 = vmatpush1.bf16.msra.mxu1 %v534_v27  ;;  %521 = vmatprep.subr.bf16.mxu0 %v520_v31  ;;  %v524_v43 = vpack.c.bf16 %v126_v40, %v119_v39  ;;  %v118_v45 = vld [vmem:[#allocation2 + $0x150] sm:$0xff]  ;;  %v125_v46 = vld [vmem:[#allocation2 + $0x188] sm:$0xff]  ;;  %v540_v47 = vpack.c.bf16 %v128_v44, %v121_v41  ;;  %v120_v48 = vld [vmem:[#allocation2 + $0x160] sm:$0xff] }
  0x1e   :  { %537 = vmatprep.subr.bf16.mxu1 %v536_v35  ;;  %v127_v49 = vld [vmem:[#allocation2 + $0x198] sm:$0xff]  ;;  %585 = vset.pattern.permute.xlu0 %v638_v1  ;;  %v81_v50 = vld [vmem:[#allocation2 + $0x28] sm:$0xff]  ;;  %v88_v51 = vld [vmem:[#allocation2 + $0x60] sm:$0xff]  ;;  %v526_v52 = vpack.c.bf16 %v125_v46, %v118_v45 }
  0x1f   :  { %v542_v53 = vpack.c.bf16 %v127_v49, %v120_v48  ;;  %v544_v54 = vpack.c.bf16 %v88_v51, %v81_v50  ;;  %v36_v62 = vld [vmem:[%s742_s1] sm:$0x7]  ;;  %v80_v10 = vld [vmem:[#allocation2 + $0x20] sm:$0xff]  ;;  %v82_v13 = vld [vmem:[#allocation2 + $0x30] sm:$0xff] }
  0x20   :  { %523 = vmatpush1.bf16.msra.mxu0 %v522_v38  ;;  %v45_v0 = vrot.slane %v36_v62, %v44_v59  ;;  %v54_v1 = vrot.slane %v36_v62, %v53_v60  ;;  %v64_v2 = vrot.slane %v36_v62, %v63_v61  ;;  %v479_v9 = vld [vmem:[%s743_s2] ss:$0 sm:$0xff]  ;;  %v89_v14 = vld [vmem:[#allocation2 + $0x68] sm:$0xff]  ;;  %v102_v16 = vld [vmem:[#allocation2 + $0xd0] sm:$0xff] }
  0x21   :  { %539 = vmatpush1.bf16.msra.mxu1 %v538_v42  ;;  %525 = vmatprep.subr.bf16.mxu0 %v524_v43  ;;  %v87_v12 = vld [vmem:[#allocation2 + $0x58] sm:$0xff]  ;;  %v561_v19 = vpack.c.bf16 %v89_v14, %v82_v13  ;;  %v94_v20 = vld [vmem:[#allocation2 + $0x90] sm:$0xff]  ;;  %v101_v23 = vld [vmem:[#allocation2 + $0xc8] sm:$0xff] }
  0x22   :  { %541 = vmatprep.subr.bf16.mxu1 %v540_v47  ;;  %v95_v15 = vld [vmem:[#allocation2 + $0x98] sm:$0xff]  ;;  %v546_v18 = vpack.c.bf16 %v87_v12, %v80_v10  ;;  %v96_v24 = vld [vmem:[#allocation2 + $0xa0] sm:$0xff]  ;;  %v109_v26 = vld [vmem:[#allocation2 + $0x108] sm:$0xff]  ;;  %v550_v28 = vpack.c.bf16 %v101_v23, %v94_v20  ;;  %v148_v47 = vsub.s32 3, %v692_v58 }
  0x23   :  { %v548_v22 = vpack.c.bf16 %v102_v16, %v95_v15  ;;  %v103_v25 = vld [vmem:[#allocation2 + $0xd8] sm:$0xff]  ;;  %v116_v27 = vld [vmem:[#allocation2 + $0x140] sm:$0xff]  ;;  %v110_v33 = vld [vmem:[#allocation2 + $0x110] sm:$0xff] }
  0x24   :  { %527 = vmatpush1.bf16.msra.mxu0 %v526_v52  ;;  %v564_v29 = vpack.c.bf16 %v103_v25, %v96_v24  ;;  %v108_v30 = vld [vmem:[#allocation2 + $0x100] sm:$0xff]  ;;  %v552_v31 = vpack.c.bf16 %v116_v27, %v109_v26  ;;  %v115_v32 = vld [vmem:[#allocation2 + $0x138] sm:$0xff]  ;;  %v117_v34 = vld [vmem:[#allocation2 + $0x148] sm:$0xff] }
  0x25   :  { %543 = vmatpush1.bf16.msra.mxu1 %v542_v53  ;;  %545 = vmatprep.subr.bf16.mxu0 %v544_v54  ;;  %v123_v35 = vld [vmem:[#allocation2 + $0x178] sm:$0xff]  ;;  %v130_v36 = vld [vmem:[#allocation2 + $0x1b0] sm:$0xff]  ;;  %v554_v37 = vpack.c.bf16 %v115_v32, %v108_v30  ;;  %v567_v38 = vpack.c.bf16 %v117_v34, %v110_v33  ;;  %v129_v41 = vld [vmem:[#allocation2 + $0x1a8] sm:$0xff] }
  0x26   :  { %560 = vmatprep.subr.bf16.mxu1 %v641_v56  ;;  %v122_v39 = vld [vmem:[#allocation2 + $0x170] sm:$0xff]  ;;  %v556_v40 = vpack.c.bf16 %v130_v36, %v123_v35  ;;  %v124_v42 = vld [vmem:[#allocation2 + $0x180] sm:$0xff]  ;;  %v131_v43 = vld [vmem:[#allocation2 + $0x1b8] sm:$0xff] }
  0x27   :  { %v558_v44 = vpack.c.bf16 %v129_v41, %v122_v39  ;;  %v570_v45 = vpack.c.bf16 %v131_v43, %v124_v42  ;;  %v132_v46 = vld [vmem:[%s745_s4] sm:$0x7f]  ;;  %s643_s4 = smov [#allocation5]  }
  0x28   :  { %v137_v48 = vrot.slane %v132_v46, %v44_v59  ;;  %v145_v49 = vrot.slane %v132_v46, %v63_v61  ;;  %v141_v50 = vrot.slane %v132_v46, %v53_v60  ;;  %v149_v51 = vrot.slane %v132_v46, %v148_v47  ;;  %s470_s11 = sshll.u32 %s643_s4, 4  ;;  %s471_s11 = int_to_ptr.vmem [resolvable:$true] %s470_s11 }
  0x29   :  { %v152_v59 = vsub.s32 4, %v692_v58  ;;  %v160_v61 = vsub.s32 6, %v692_v58  ;;  %s608_s12 = scalar_lea.vmem %s471_s11, 896  ;;  %p613_p9 = scmp.lt.s32.totalorder %s471_s11, %s471_s11 }
  0x2a   :  { %p609_p8 = scmp.ne.s32.totalorder %s471_s11, %s608_s12  ;;  %p614_p10 = scmp.lt.s32.totalorder %s608_s12, %s608_s12 }
  0x2b   :  { %v153_v60 = vrot.slane %v132_v46, %v152_v59 }
  0x2c   :  { %p615_p11 = por %p614_p10, %p613_p9 }
  0x2e   :  { %p616_p12 = pnand %p615_p11, %p609_p8 }
  0x94   :  { %v40_v63 = vpop.permute.xlu0 %39  ;;  %v59_v3 = vpop.permute.xlu1 %58 }
  0x95   :  { %v46_v5 = vmul.f32 %v45_v0, %v40_v63  ;;  %v65_v7 = vmul.f32 %v64_v2, %v59_v3  ;;  %v156_v0 = vsub.s32 5, %v692_v58 }
  0x97   :  { %v157_v2 = vrot.slane %v132_v46, %v156_v0 }
  0x99   :  { %v49_v4 = vpop.permute.xlu0 %48 }
  0x9a   :  { %v55_v6 = vmul.f32 %v54_v1, %v49_v4  ;;  %v161_v1 = vrot.slane %v132_v46, %v160_v61 }
  0x9c   :  { %v56_v8 = vadd.f32 %v55_v6, %v46_v5 }
  0x9e   :  { %v66_v11 = vadd.f32 %v65_v7, %v56_v8 }
  0xa0   :  { %v74_v17 = vadd.f32 %v479_v9, %v66_v11 }
  0xa2   :  { %v75_v21 = vmax.f32 %v74_v17, 0.0 }
  0xa4   :  { %480 = vmatmul.mubr.msk.f32.vlgmr.msra.gmra.mrb[0].mxu0 %vm169_vm0, %v75_v21  ;;  %481 = vmatmul.mubr.msk.f32.vlgmr.msra.gmra.mrb[0].mxu1 %vm169_vm0, %v75_v21 }
  0xa5   :  { %547 = vmatpush1.bf16.msra.mxu0 %v546_v18  ;;  %562 = vmatpush3.bf16.msra.mxu1 %v561_v19 }
  0xa6   :  { %549 = vmatprep.subr.bf16.mxu0 %v548_v22  ;;  %563 = vmatprep.subr.bf16.mxu1 %v641_v56 }
  0xa7   :  { %379 = vmatprep.mubr.f32.mxu0 %v640_v55  ;;  %509 = vmatprep.mubr.msk.f32.mxu1 %vm642_vm1, %v640_v55 }
  0xa9   :  { %551 = vmatpush1.bf16.msra.mxu0 %v550_v28  ;;  %565 = vmatpush3.bf16.msra.mxu1 %v564_v29 }
  0xaa   :  { %553 = vmatprep.subr.bf16.mxu0 %v552_v31  ;;  %566 = vmatprep.subr.bf16.mxu1 %v641_v56 }
  0xad   :  { %555 = vmatpush1.bf16.msra.mxu0 %v554_v37  ;;  %568 = vmatpush3.bf16.msra.mxu1 %v567_v38 }
  0xae   :  { %557 = vmatprep.subr.bf16.mxu0 %v556_v40  ;;  %569 = vmatprep.subr.bf16.mxu1 %v641_v56 }
  0xb1   :  { %559 = vmatpush1.bf16.msra.mxu0 %v558_v44  ;;  %571 = vmatpush3.bf16.msra.mxu1 %v570_v45 }
  0xb4   :  { %482 = vmatmul.mubr.msk.f32.vlgmr.msra.gmra.mrb[2].mxu0 %vm169_vm0, %v75_v21  ;;  %510 = vmatmul.mubr.msk.f32.vlgmr.msra.gmra.mrb[2].mxu1 %vm169_vm0, %v75_v21 }
 0x177   :  { %v239_v52 = vpop.f32.mrb[0].mxu0  ;;  %v310_v53 = vpop.f32.mrb[0].mxu1 }
 0x178   :  { %v240_v54 = vadd.f32 %v239_v52, %v137_v48  ;;  %v311_v55 = vadd.f32 %v310_v53, %v145_v49  ;;  %v241_v56 = vpop.f32.mrb[1].mxu0  ;;  %v312_v57 = vpop.f32.mrb[1].mxu1 }
 0x179   :  { %v242_v62 = vadd.f32 %v241_v56, %v141_v50  ;;  %v313_v63 = vadd.f32 %v312_v57, %v149_v51 }
 0x17a   :  { %456 = vst [vmem:[#allocation5] sm:$0xff] %v240_v54  ;;  %458 = vst [vmem:[#allocation5 + $0x10] sm:$0xff] %v311_v55 }
 0x17b   :  { %457 = vst [vmem:[#allocation5 + $0x8] sm:$0xff] %v242_v62  ;;  %459 = vst [vmem:[#allocation5 + $0x18] sm:$0xff] %v313_v63 }
 0x187   :  { %v381_v3 = vpop.f32.mrb[2].mxu0  ;;  %v452_v4 = vpop.f32.mrb[2].mxu1 }
 0x188   :  { %v382_v5 = vadd.f32 %v381_v3, %v153_v60  ;;  %v453_v6 = vadd.f32 %v452_v4, %v161_v1  ;;  %v383_v7 = vpop.f32.mrb[3].mxu0  ;;  %v511_v8 = vpop.f32.mrb[3].mxu1 }
 0x189   :  { %v384_v9 = vadd.f32 %v383_v7, %v157_v2 }
 0x18a   :  { %460 = vst [vmem:[#allocation5 + $0x20] sm:$0xff] %v382_v5  ;;  %463 = vst.msk [vmem:[#allocation5 + $0x30] sm:$0xff] %vm462_vm2, %v453_v6 }
 0x18b   :  { %461 = vst [vmem:[#allocation5 + $0x28] sm:$0xff] %v384_v9 }
 0x18c   :  { %619 = shalt.err (!%p616_p12)
}
 0x18d   :  { %s620_s15 = scalar_lea.hbm %s746_s5, 896 }
 0x18e   :  { %p621_p13 = scmp.ne.s32.totalorder %s746_s5, %s620_s15  ;;  %p624_p0 = scmp.lt.u32.totalorder %s620_s15, %s746_s5 }
 0x190   :  { %p626_p1 = pnand %p624_p0, %p621_p13 }
 0x192   :  { %629 = shalt.err (!%p626_p1)
}
 0x193   :  { %473 = dma.vmem_to_hbm [thread:$0]  %s471_s11, 896, %s746_s5, [#allocation4]  }
 0x194   :  { %632 = dma.done.wait [#allocation4], 896  }
 0x195   :  { %633 = vsyncadd [#allocation4], 4294966400 }
 0x196   :  { %477 = vsyncpa [#allocation3], 1 }
 0x197   :  { %478 = vsyncpa [#allocation4], 1 }

</bundles_post_ra>
